<compile_context>
chip_gen: v6e
topology: v6e:2x2x1
jax: 0.10.0
libtpu: 0.0.40
codegen_flags: <defaults>
</compile_context>

<pallas_src>
import jax
import jax.numpy as jnp
from jax.experimental import pallas as pl
from jax.experimental.pallas import tpu as pltpu


def _linear_kernel(x_ref, wt_ref, b_ref, o_ref):
    """One batch tile of y = x @ W.T + b, emitted lane-dense as (C, TILE_B)."""
    # x_ref : (TILE_B, F)   wt_ref : (F, C)   b_ref : (C, 1)   o_ref : (C, TILE_B)
    acc = jax.lax.dot_general(
        wt_ref[...], x_ref[...],
        dimension_numbers=(((0,), (1,)), ((), ())),   # contract F with F -> (C, TILE_B)
        preferred_element_type=jnp.float32,
    )
    o_ref[...] = (acc + b_ref[...]).astype(o_ref.dtype)


def _round_up(n, m):
    return ((n + m - 1) // m) * m


def logistic_regression_forward(x, w, b, *, tile_b=1024):
    """x: (B, F) f32, w: (C, F) f32 (PyTorch nn.Linear layout), b: (C,) f32."""
    B, F = x.shape
    C = w.shape[0]

    # Batch tile: multiple of 8; small batches collapse to a single full tile.
    tb = min(tile_b, _round_up(B, 8))
    pb = _round_up(B, tb)
    if pb != B:
        x = jnp.pad(x, ((0, pb - B), (0, 0)))        # zero rows -> bias rows, sliced off below
    grid = (pb // tb,)

    wt = w.T                     # (F, C) — stays VMEM-resident (constant index_map)
    b2 = b.reshape(C, 1)         # bias column, broadcast over the lane (batch) axis

    cost = pl.CostEstimate(
        flops=2 * B * F * C,
        transcendentals=0,
        bytes_accessed=(B * F + B * C + F * C + C) * 4,
    )

    out_t = pl.pallas_call(
        _linear_kernel,
        out_shape=jax.ShapeDtypeStruct((C, pb), x.dtype),
        grid_spec=pltpu.PrefetchScalarGridSpec(
            num_scalar_prefetch=0,
            grid=grid,
            in_specs=[
                pl.BlockSpec((tb, F), lambda i: (i, 0)),   # stream x batch tiles
                pl.BlockSpec((F, C), lambda i: (0, 0)),    # weights resident
                pl.BlockSpec((C, 1), lambda i: (0, 0)),    # bias resident
            ],
            out_specs=pl.BlockSpec((C, tb), lambda i: (0, i)),  # lane-dense output
        ),
        compiler_params=pltpu.CompilerParams(
            dimension_semantics=("parallel",),             # dual-TC sharding on v7x
            vmem_limit_bytes=32 * 1024 * 1024,             # bounded footprint on 64 MiB v7x VMEM
        ),
        cost_estimate=cost,
    )(x, wt, b2)

    return out_t[:, :B].T                                   # back to (B, C)


if __name__ == "__main__":
    # Module: LogisticRegression(n_features, n_classes) -> nn.Linear(n_features, 2)
    # NOTE: the reference module hardcodes 2 output units regardless of n_classes.
    n_features = 32
    out_features = 2

    key = jax.random.PRNGKey(0)
    kx, kw, kb, kx2 = jax.random.split(key, 4)

    bound = 1.0 / jnp.sqrt(jnp.float32(n_features))
    w = jax.random.uniform(kw, (out_features, n_features),
                           dtype=jnp.float32, minval=-bound, maxval=bound)
    b = jax.random.uniform(kb, (out_features,),
                           dtype=jnp.float32, minval=-bound, maxval=bound)

    # Small shape matching the module's typical use.
    batch = 8
    x = jax.random.normal(kx, (batch, n_features), dtype=jnp.float32)
    out = logistic_regression_forward(x, w, b)
    jax.block_until_ready(out)
    ref = x @ w.T + b
    assert out.shape == (batch, out_features)
    assert jnp.allclose(out, ref, atol=1e-5, rtol=1e-5)

    # Second check exercising the multi-tile + padding path (still tiny).
    batch2 = 1040
    x2 = jax.random.normal(kx2, (batch2, n_features), dtype=jnp.float32)
    out2 = logistic_regression_forward(x2, w, b)
    jax.block_until_ready(out2)
    ref2 = x2 @ w.T + b
    assert out2.shape == (batch2, out_features)
    assert jnp.allclose(out2, ref2, atol=1e-5, rtol=1e-5)

    print("KERNEL_OK")
</pallas_src>

<mosaic_0001>
module attributes {stable_mosaic.version = 11 : i64} {
  func.func @_linear_kernel(%arg0: i32, %arg1: memref<8x32xf32, #tpu.memory_space<vmem>>, %arg2: memref<32x2xf32, #tpu.memory_space<vmem>>, %arg3: memref<2x1xf32, #tpu.memory_space<vmem>>, %arg4: memref<2x8xf32, #tpu.memory_space<vmem>>) attributes {dimension_semantics = [#tpu.dimension_semantics<parallel>], iteration_bounds = array<i64: 1>, scalar_prefetch = 0 : i64, scratch_operands = 0 : i64, tpu.core_type = #tpu.core_type<tc>, window_params = [{transform_indices = @transform_0, window_bounds = array<i64: 8, 32>}, {pipeline_mode = #tpu.pipeline_mode<synchronous>, transform_indices = @transform_1, window_bounds = array<i64: 32, 2>}, {pipeline_mode = #tpu.pipeline_mode<synchronous>, transform_indices = @transform_2, window_bounds = array<i64: 2, 1>}, {transform_indices = @transform_3, window_bounds = array<i64: 2, 8>}]} {
    %c0 = arith.constant 0 : index
    %c0_0 = arith.constant 0 : index
    %0 = vector.load %arg2[%c0, %c0_0] : memref<32x2xf32, #tpu.memory_space<vmem>>, vector<32x2xf32>
    %c0_1 = arith.constant 0 : index
    %c0_2 = arith.constant 0 : index
    %1 = vector.load %arg1[%c0_1, %c0_2] : memref<8x32xf32, #tpu.memory_space<vmem>>, vector<8x32xf32>
    %cst = arith.constant dense<0.000000e+00> : vector<2x8xf32>
    %2 = tpu.matmul %0, %1, %cst {dimension_numbers = #tpu.dot_dimension_numbers<[0], [1], [1], [0], [0, 1, 1, 0], [], []>} : vector<32x2xf32>, vector<8x32xf32>, vector<2x8xf32> -> vector<2x8xf32>
    %c0_3 = arith.constant 0 : index
    %c0_4 = arith.constant 0 : index
    %3 = vector.load %arg3[%c0_3, %c0_4] : memref<2x1xf32, #tpu.memory_space<vmem>>, vector<2x1xf32>
    %4 = vector.broadcast %3 : vector<2x1xf32> to vector<2x8xf32>
    %5 = arith.addf %2, %4 : vector<2x8xf32>
    %c0_5 = arith.constant 0 : index
    %c0_6 = arith.constant 0 : index
    %6 = vector.load %arg4[%c0_5, %c0_6] : memref<2x8xf32, #tpu.memory_space<vmem>>, vector<2x8xf32>
    tpu.vector_store %arg4[%c0_5, %c0_6], %5 {strides = array<i32>} : memref<2x8xf32, #tpu.memory_space<vmem>>, vector<2x8xf32>,
    return
  }
  func.func @transform_0(%arg0: i32) -> (i32, i32) {
    %c0_i32 = arith.constant 0 : i32
    %c0_i32_0 = arith.constant 0 : i32
    return %arg0, %c0_i32 : i32, i32
  }
  func.func @transform_1(%arg0: i32) -> (i32, i32) {
    %c0_i32 = arith.constant 0 : i32
    %c0_i32_0 = arith.constant 0 : i32
    %c0_i32_1 = arith.constant 0 : i32
    return %c0_i32, %c0_i32_0 : i32, i32
  }
  func.func @transform_2(%arg0: i32) -> (i32, i32) {
    %c0_i32 = arith.constant 0 : i32
    %c0_i32_0 = arith.constant 0 : i32
    %c0_i32_1 = arith.constant 0 : i32
    return %c0_i32, %c0_i32_0 : i32, i32
  }
  func.func @transform_3(%arg0: i32) -> (i32, i32) {
    %c0_i32 = arith.constant 0 : i32
    %c0_i32_0 = arith.constant 0 : i32
    return %c0_i32, %arg0 : i32, i32
  }
}

</mosaic_0001>

<bundles_post_ra>
// kernel: tpu_custom_call.1
= control target key start
LH: loop header
LB: loop body
LE: loop exit
PB: predicated region body
PF: predicated region fallthrough
CT: control target
= control target key end

     0   :  { %vm58_vm0 = vcmask 261120   ;;  %v188_v1 = vmov 0.0   ;;  %vm189_vm1 = vmmov 0   ;;  %s235_s0 = inlined_call_operand.vmem [shape: f32[8,32], index: 0, kind: input, shape index: {}]   ;;  %s236_s1 = inlined_call_operand.vmem [shape: f32[32,2], index: 1, kind: input, shape index: {}]   ;;  %s237_s2 = inlined_call_operand.vmem [shape: f32[2,1], index: 2, kind: input, shape index: {}]   ;;  %s238_s3 = inlined_call_operand.hbm [shape: f32[2,8], index: 3, kind: output, shape index: {}]  }
   0x1   :  { %v15_v0 = vld [vmem:[%s236_s1] sm:$0xff]  ;;  %155 = vmatprep.subr.mxu0 %v188_v1  ;;  %v16_v4 = vld [vmem:[%s236_s1 + $0x8] sm:$0xff]  ;;  %157 = vmatprep.mubr.msk.f32.mxu0 %vm189_vm1, %v188_v1 }
   0x2   :  { %26 = vxpose.xlu0.b32.start [1/4] (short) (narrow) %v15_v0, 8  ;;  %v19_v2 = vld [vmem:[%s235_s0] sm:$0xff] }
   0x3   :  { %v20_v3 = vld [vmem:[%s237_s2] sm:$0x3]  ;;  %156 = vmatpush3.xpose.msk.msra.mxu0 %vm58_vm0, %v19_v2 }
   0x4   :  { %8 = vsyncpa [#allocation3], 0  ;;  %v190_v5 = vmov 0   ;;  %v17_v6 = vld [vmem:[%s236_s1 + $0x10] sm:$0xff]  ;;  %v18_v7 = vld [vmem:[%s236_s1 + $0x18] sm:$0xff]  ;;  %s191_s22 = smov [#allocation2]  }
   0x5   :  { %164 = vset.pattern.permute.xlu1 %v190_v5  ;;  %s143_s23 = sshll.u32 %s191_s22, 4  ;;  %vm135_vm2 = vcmask 58368   ;;  %s144_s23 = int_to_ptr.vmem [resolvable:$true] %s143_s23 }
   0x6   :  { %23 = vperm.xlu1 %164, %v20_v3   ;;  %27 = vxpose.xlu0.b32.cont [2/4] (short) (narrow) %v16_v4, 8  ;;  %s166_s24 = scalar_lea.vmem %s144_s23, 32  ;;  %p171_p1 = scmp.lt.s32.totalorder %s144_s23, %s144_s23 }
   0x7   :  { %p167_p0 = scmp.ne.s32.totalorder %s144_s23, %s166_s24  ;;  %p172_p2 = scmp.lt.s32.totalorder %s166_s24, %s166_s24 }
   0x9   :  { %p173_p3 = por %p172_p2, %p171_p1 }
   0xa   :  { %28 = vxpose.xlu0.b32.cont [3/4] (short) (narrow) %v17_v6, 8 }
   0xb   :  { %p174_p4 = pnand %p173_p3, %p167_p0 }
   0xe   :  { %29 = vxpose.xlu0.b32.end [4/4] (short) (narrow) %v18_v7, 8 }
  0x37   :  { %165 = vset.pattern.permute.xlu0 %v190_v5 }
  0x7e   :  { %v42_v8 = vpop.trf.xlu0 }
  0x7f   :  { %158 = vmatmul.mubr.msk.f32.vlgmr.msra.gmra.mxu0 %vm58_vm0, %v42_v8 }
  0x81   :  { %v24_v9 = vpop.permute.xlu1 %23 }
 0x13f   :  { %v131_v10 = vpop.f32.mrf.mxu0 }
 0x140   :  { %v132_v11 = vadd.f32 %v131_v10, %v24_v9 }
 0x141   :  { %v159_v12 = vpop.f32.mrf.mxu0 }
 0x142   :  { %136 = vst.msk [vmem:[#allocation2] sm:$0x3] %vm135_vm2, %v132_v11 }
 0x143   :  { %177 = shalt.err (!%p174_p4)
}
 0x144   :  { %146 = dma.vmem_to_hbm [thread:$0]  %s144_s23, 32, %s238_s3, [#allocation3]  }
 0x145   :  { %186 = dma.done.wait [#allocation3], 32  }
 0x146   :  { %187 = vsyncadd [#allocation3], 4294967264 }
 0x147   :  { %150 = vsyncpa [#allocation3], 1 }

</bundles_post_ra>
